<compile_context>
chip_gen: v7x
topology: tpu7x:2x2x1
jax: 0.10.0
libtpu: 0.0.40
codegen_flags: <defaults>
</compile_context>

<pallas_src>
import numpy as np

import jax
import jax.numpy as jnp
from jax import lax
from jax.experimental import pallas as pl
from jax.experimental.pallas import tpu as pltpu

K = 7  # AvgPool2d kernel size (stride = 1), as in the PyTorch module


def _round_up(a, b):
    return (a + b - 1) // b * b


def _make_weight_row(H, W):
    """Fused per-pixel weight map (1, H*W): window coverage / 49 / (H'+W')."""
    Hp = H - K + 1
    Wp = W - K + 1
    assert Hp >= 1 and Wp >= 1, "ImageModel requires H >= 7 and W >= 7"
    ri = np.arange(H, dtype=np.int64)[:, None]
    ci = np.arange(W, dtype=np.int64)[None, :]
    cnt_h = np.minimum(ri, Hp - 1) - np.maximum(ri - (K - 1), 0) + 1
    cnt_w = np.minimum(ci, Wp - 1) - np.maximum(ci - (K - 1), 0) + 1
    w = (cnt_h * cnt_w).astype(np.float32) / float(K * K) / float(Hp + Wp)
    return w.reshape(1, H * W)


def _image_model_kernel(w_ref, x_ref, o_ref):
    # w_ref: (tm, HW) fused weights, pre-replicated on host; same block every
    #        grid step -> resident in VMEM, no per-step DMA or broadcast.
    # x_ref: (tm, HW) sublane-packed rows (one row per (n, c) pair).
    # o_ref: (tm, 1) per-row result.
    # One elementwise VPU multiply + one cross-lane (XLU) reduce; no broadcasts.
    o_ref[...] = jnp.sum(
        x_ref[...] * w_ref[...], axis=-1, keepdims=True
    ).astype(o_ref.dtype)


def image_model_forward(x):
    """Pallas equivalent of ImageModel.forward. x: (N, C, H, W) float -> (N, C)."""
    N, C, H, W = x.shape
    HW = H * W
    R = N * C
    itemsize = jnp.dtype(x.dtype).itemsize

    # --- Generation-aware VMEM budget ------------------------------------
    try:
        vmem_cap = int(pltpu.get_tpu_info().vmem_capacity_bytes)
    except Exception:  # no live device / older runtime: assume the small case
        vmem_cap = 64 * 1024 * 1024
    small_vmem = vmem_cap <= 64 * 1024 * 1024          # v7x-class (64 MiB/TC)
    # Budget for the double-buffered x input (both buffers together).
    dbuf_budget = (12 if small_vmem else 20) * 1024 * 1024

    # --- Row tile (multiple of 8, or the full row count) ------------------
    hw_pad = _round_up(HW, 128)                         # lane-padded row width
    bytes_per_8rows = 8 * hw_pad * itemsize
    rows8 = max(1, dbuf_budget // (2 * bytes_per_8rows))
    tm = min(R, 8 * rows8)                              # no forced batch split:
    grid = (pl.cdiv(R, tm),)                            # tiny inputs -> 1 step

    # --- Inputs ------------------------------------------------------------
    x2d = x.reshape(R, HW)                              # contiguous NCHW: free
    # Pre-replicate the weight to the full tile height (resident thereafter).
    weight = jnp.asarray(
        np.ascontiguousarray(np.broadcast_to(_make_weight_row(H, W), (tm, HW))),
        dtype=jnp.float32,
    )

    # --- VMEM limit from the actual padded footprint -----------------------
    tm_pad = _round_up(tm, 8)
    tile_bytes = tm_pad * hw_pad * itemsize
    out_bytes = tm_pad * 128 * itemsize                 # (tm, 1) lane-padded
    footprint = 3 * tile_bytes + 2 * out_bytes          # x double-buf + weight + out
    cap = (48 if small_vmem else 112) * 1024 * 1024
    vmem_limit = int(min(cap, max(32 * 1024 * 1024, footprint + 8 * 1024 * 1024)))

    out2d = pl.pallas_call(
        _image_model_kernel,
        out_shape=jax.ShapeDtypeStruct((R, 1), x.dtype),
        grid=grid,
        in_specs=[
            # Same block every step -> weight stays resident in VMEM.
            pl.BlockSpec((tm, HW), lambda n: (0, 0)),
            # Sublane-packed, lane-dense input tile.
            pl.BlockSpec((tm, HW), lambda n: (n, 0)),
        ],
        # (tm, 1) output: sub-128 lane store is negligible at these sizes.
        out_specs=pl.BlockSpec((tm, 1), lambda n: (n, 0)),
        compiler_params=pltpu.CompilerParams(
            # Only matters when the grid has >1 step (large N*C); lets v7x
            # megacore shard the row axis, harmless on single-TC v5e/v6e.
            dimension_semantics=("parallel",),
            vmem_limit_bytes=vmem_limit,
        ),
    )(weight, x2d)
    return out2d.reshape(N, C)


def _reference_forward(x):
    """Pure-JAX reference mirroring the PyTorch module (sanity check)."""
    pooled = lax.reduce_window(
        x, 0.0, lax.add,
        window_dimensions=(1, 1, K, K),
        window_strides=(1, 1, 1, 1),
        padding="VALID",
    ) / float(K * K)
    Hp, Wp = pooled.shape[2], pooled.shape[3]
    div = Wp + Hp
    out = pooled.sum(axis=3).sum(axis=2)
    return out.reshape(out.shape[0], -1) / div


if __name__ == "__main__":
    key = jax.random.PRNGKey(0)
    # Small shapes consistent with the module: N=2, C=4, H=W=16 (pooled 10x10).
    x = jax.random.normal(key, (2, 4, 16, 16), dtype=jnp.float32)

    out = image_model_forward(x)
    out = jax.block_until_ready(out)

    ref = _reference_forward(x)
    assert out.shape == (2, 4), out.shape
    assert jnp.allclose(out, ref, atol=1e-5, rtol=1e-5), (out, ref)

    print("KERNEL_OK")
</pallas_src>

<mosaic_0001>
module attributes {stable_mosaic.version = 11 : i64} {
  func.func @_image_model_kernel(%arg0: i32, %arg1: memref<8x256xf32, #tpu.memory_space<vmem>>, %arg2: memref<8x256xf32, #tpu.memory_space<vmem>>, %arg3: memref<8x1xf32, #tpu.memory_space<vmem>>) attributes {dimension_semantics = [#tpu.dimension_semantics<parallel>], iteration_bounds = array<i64: 1>, scalar_prefetch = 0 : i64, scratch_operands = 0 : i64, tpu.core_type = #tpu.core_type<tc>, window_params = [{pipeline_mode = #tpu.pipeline_mode<synchronous>, transform_indices = @transform_0, window_bounds = array<i64: 8, 256>}, {transform_indices = @transform_1, window_bounds = array<i64: 8, 256>}, {transform_indices = @transform_2, window_bounds = array<i64: 8, 1>}]} {
    %c0 = arith.constant 0 : index
    %c0_0 = arith.constant 0 : index
    %0 = vector.load %arg2[%c0, %c0_0] : memref<8x256xf32, #tpu.memory_space<vmem>>, vector<8x256xf32>
    %c0_1 = arith.constant 0 : index
    %c0_2 = arith.constant 0 : index
    %1 = vector.load %arg1[%c0_1, %c0_2] : memref<8x256xf32, #tpu.memory_space<vmem>>, vector<8x256xf32>
    %2 = arith.mulf %0, %1 : vector<8x256xf32>
    %cst = arith.constant dense<0.000000e+00> : vector<8xf32>
    %3 = vector.multi_reduction <add>, %2, %cst [1] : vector<8x256xf32> to vector<8xf32>
    %4 = vector.shape_cast %3 : vector<8xf32> to vector<8x1xf32>
    %c0_3 = arith.constant 0 : index
    %c0_4 = arith.constant 0 : index
    %5 = vector.load %arg3[%c0_3, %c0_4] : memref<8x1xf32, #tpu.memory_space<vmem>>, vector<8x1xf32>
    tpu.vector_store %arg3[%c0_3, %c0_4], %4 {strides = array<i32>} : memref<8x1xf32, #tpu.memory_space<vmem>>, vector<8x1xf32>,
    return
  }
  func.func @transform_0(%arg0: i32) -> (i32, i32) {
    %c0_i32 = arith.constant 0 : i32
    %c0_i32_0 = arith.constant 0 : i32
    %c0_i32_1 = arith.constant 0 : i32
    return %c0_i32, %c0_i32_0 : i32, i32
  }
  func.func @transform_1(%arg0: i32) -> (i32, i32) {
    %c0_i32 = arith.constant 0 : i32
    %c0_i32_0 = arith.constant 0 : i32
    return %arg0, %c0_i32 : i32, i32
  }
  func.func @transform_2(%arg0: i32) -> (i32, i32) {
    %c0_i32 = arith.constant 0 : i32
    %c0_i32_0 = arith.constant 0 : i32
    return %arg0, %c0_i32 : i32, i32
  }
}

</mosaic_0001>

<bundles_post_ra>
// kernel: tpu_custom_call.1
= control target key start
LH: loop header
LB: loop body
LE: loop exit
PB: predicated region body
PF: predicated region fallthrough
CT: control target
= control target key end

     0   :  { %7 = vsyncpa [#allocation3], 0  ;;  %s146_s0 = inlined_call_operand.hbm [shape: f32[8,256], index: 0, kind: input, shape index: {}]   ;;  %s147_s1 = inlined_call_operand.hbm [shape: f32[8,256], index: 1, kind: input, shape index: {}]   ;;  %s148_s2 = inlined_call_operand.vmem [shape: f32[8,1], index: 2, kind: output, shape index: {}]  }
   0x1   :  { %8 = vsyncpa [#allocation5], 0  ;;  %s102_s9 = smov [#allocation2]   ;;  %s103_s11 = smov [#allocation4]  }
   0x2   :  { %s15_s10 = sshll.u32 %s102_s9, 4  ;;  %s25_s12 = sshll.u32 %s103_s11, 4  ;;  %s16_s10 = int_to_ptr.vmem [resolvable:$true] %s15_s10  ;;  %s26_s12 = int_to_ptr.vmem [resolvable:$true] %s25_s12 }
   0x3   :  { %s54_s15 = scalar_lea.hbm %s146_s0, 256 }
   0x4   :  { %p55_p0 = scmp.ne.s32.totalorder %s146_s0, %s54_s15  ;;  %p58_p1 = scmp.lt.u32.totalorder %s54_s15, %s146_s0 }
   0x6   :  { %p60_p2 = pnand %p58_p1, %p55_p0 }
   0x8   :  { %63 = shalt.err (!%p60_p2)
}
   0x9   :  { %s64_s20 = scalar_lea.vmem %s16_s10, 256  ;;  %p69_p4 = scmp.lt.s32.totalorder %s16_s10, %s16_s10 }
   0xa   :  { %p65_p3 = scmp.ne.s32.totalorder %s16_s10, %s64_s20  ;;  %p70_p5 = scmp.lt.s32.totalorder %s64_s20, %s64_s20 }
   0xc   :  { %p71_p6 = por %p70_p5, %p69_p4 }
   0xe   :  { %p72_p7 = pnand %p71_p6, %p65_p3 }
  0x10   :  { %75 = shalt.err (!%p72_p7)
}
  0x11   :  { %18 = dma.hbm_to_vmem [thread:$0]  %s146_s0, 256, %s16_s10, [#allocation3]  }
  0x12   :  { %s76_s25 = scalar_lea.hbm %s147_s1, 256 }
  0x13   :  { %p77_p8 = scmp.ne.s32.totalorder %s147_s1, %s76_s25  ;;  %p80_p9 = scmp.lt.u32.totalorder %s76_s25, %s147_s1 }
  0x15   :  { %p82_p10 = pnand %p80_p9, %p77_p8 }
  0x17   :  { %85 = shalt.err (!%p82_p10)
}
  0x18   :  { %s86_s30 = scalar_lea.vmem %s26_s12, 256  ;;  %p91_p12 = scmp.lt.s32.totalorder %s26_s12, %s26_s12 }
  0x19   :  { %p87_p11 = scmp.ne.s32.totalorder %s26_s12, %s86_s30  ;;  %p92_p13 = scmp.lt.s32.totalorder %s86_s30, %s86_s30 }
  0x1b   :  { %p93_p0 = por %p92_p13, %p91_p12 }
  0x1d   :  { %p94_p1 = pnand %p93_p0, %p87_p11 }
  0x1f   :  { %97 = shalt.err (!%p94_p1)
}
  0x20   :  { %28 = dma.hbm_to_vmem [thread:$0]  %s147_s1, 256, %s26_s12, [#allocation5]  }
  0x21   :  { %98 = dma.done.wait [#allocation3], 256  }
  0x22   :  { %99 = vsyncadd [#allocation3], 4294967040 }
  0x23   :  { %100 = dma.done.wait [#allocation5], 256  }
  0x24   :  { %101 = vsyncadd [#allocation5], 4294967040  ;;  %v35_v0 = vld [vmem:[#allocation4] sm:$0xff]  ;;  %v36_v1 = vld [vmem:[#allocation4 + $0x8] sm:$0xff]  ;;  %vm44_vm0 = vcmask 7168  }
  0x25   :  { %v37_v2 = vld [vmem:[#allocation2] sm:$0xff]  ;;  %v38_v3 = vld [vmem:[#allocation2 + $0x8] sm:$0xff] }
  0x26   :  { %v39_v4 = vmul.f32 %v37_v2, %v35_v0  ;;  %v40_v5 = vmul.f32 %v38_v3, %v36_v1 }
  0x28   :  { %v41_v6 = vadd.f32 %v40_v5, %v39_v4 }
  0x2a   :  { %42 = vadd.xlane.f32.xlu0 %v41_v6 }
  0xb7   :  { %v43_v7 = vpop.xlane.xlu0 %42 }
  0xb8   :  { %45 = vst.msk [vmem:[%s148_s2] sm:$0xff] %vm44_vm0, %v43_v7 }
  0xb9   :  { %50 = vsyncpa [#allocation3], 1 }
  0xba   :  { %51 = vsyncpa [#allocation5], 1 }

</bundles_post_ra>
